<compile_context>
chip_gen: v6e
topology: v6e:2x2x1
jax: 0.10.0
libtpu: 0.0.40
codegen_flags: <defaults>
</compile_context>

<pallas_src>
import functools

import jax
import jax.numpy as jnp
from jax import lax
from jax.experimental import pallas as pl
from jax.experimental.pallas import tpu as pltpu

_EPS = 1e-9
FEATURE_DIM = 128   # small stand-in for the module's default 1024
BATCH = 8


def _choose_hidden_tile(d):
    # Prefer ~256-wide hidden tiles: enough grid steps to pipeline weight DMA,
    # modest per-tile VMEM.  Fall back to the full dim (grid of 1).
    for tk in (256, 512, 128):
        if d % tk == 0 and d // tk >= 2:
            return tk
    return d


def _choose_row_tile(d):
    # Row-tile size for the log(p_x*p_y + eps) slabs in the finalize step.
    for rt in (256, 128):
        if d % rt == 0:
            return rt
    return d


# ---------------------------------------------------------------------------
# Fused kernel: shared fc on [x; y] (hidden dim k-tiled) + MI reduction
# ---------------------------------------------------------------------------
def mi_alignment_kernel(xy_ref, w1_ref, b1_ref, w2_ref, b2_ref, mi_ref, acc_ref,
                        *, batch, row_tile):
    k = pl.program_id(0)
    nk = pl.num_programs(0)

    # ----- fused MLP, hidden dimension tiled over the grid ------------------
    @pl.when(k == 0)
    def _():
        # Initialise the (2B, D) f32 accumulator with the second-layer bias.
        acc_ref[...] = jnp.broadcast_to(b2_ref[...], acc_ref.shape)

    xy = xy_ref[...]                                              # (2B, D), f32 or bf16
    h = jnp.dot(xy, w1_ref[...], preferred_element_type=jnp.float32)  # (2B, tk) f32
    h = jnp.maximum(h + b1_ref[...], 0.0)                         # bias + ReLU per tile
    h = h.astype(xy.dtype)                                        # keep 2nd dot on bf16 MXU path
    acc_ref[...] += jnp.dot(h, w2_ref[...], preferred_element_type=jnp.float32)

    # ----- finalize: mutual-information reduction on the last hidden tile ---
    @pl.when(k == nk - 1)
    def _():
        eps = jnp.float32(_EPS)
        f = acc_ref[...]                                          # (2B, D) f32
        d = f.shape[1]
        fx = f[:batch, :]                                         # (B, D)
        fy = f[batch:, :]                                         # (B, D)
        inv_b = jnp.float32(1.0 / batch)

        # Rank-1 rewrite of the joint: q[b, j] = fy[b, j] / sum_j fy[b, j].
        sy = jnp.sum(fy, axis=1, keepdims=True)                   # (B, 1)
        q = fy / sy                                               # (B, D)

        # term1 = sum_{b,i,j} q*log(q+eps) = D * sum_{b,j} q*log(q+eps)
        t1 = jnp.sum(jnp.sum(q * jnp.log(q + eps), axis=1, keepdims=True),
                     axis=0, keepdims=True) * jnp.float32(d)      # (1, 1)

        # Marginals: p_y as a lane row; p_x directly as a sublane column via a
        # tiny MXU contraction over the batch axis (no transpose / diag trick).
        py_row = jnp.sum(fy, axis=0, keepdims=True) * inv_b       # (1, D)
        ones_b = jnp.ones((batch, 1), jnp.float32)
        px_col = lax.dot_general(fx, ones_b, (((0,), (0,)), ((), ())),
                                 preferred_element_type=jnp.float32) * inv_b  # (D, 1)

        # term2 = sum_j (sum_b q[b,j]) * sum_i log(p_x[i]*p_y[j]+eps)
        # Built in (row_tile, D) slabs (no full (D, D) materialisation) and
        # contracted against qsum on the MXU (matvec), off the VPU/store slots.
        qsum = jnp.sum(q, axis=0, keepdims=True)                  # (1, D)
        t2 = jnp.zeros((1, 1), jnp.float32)
        for r in range(d // row_tile):                            # static, few iterations
            px_t = px_col[r * row_tile:(r + 1) * row_tile, :]     # (rt, 1)
            log_pp = jnp.log(px_t * py_row + eps)                 # (rt, D) — the D^2 EUP logs
            part = lax.dot_general(log_pp, qsum, (((1,), (1,)), ((), ())),
                                   preferred_element_type=jnp.float32)  # (rt, 1)
            t2 = t2 + jnp.sum(part, axis=0, keepdims=True)        # (1, 1)

        mi_ref[...] = t1 - t2


# ---------------------------------------------------------------------------
# Full module forward (single fused pallas_call)
# ---------------------------------------------------------------------------
@functools.partial(jax.jit, static_argnames=("use_bf16_matmul",))
def mi_alignment_forward(x, y, w1, b1, w2, b2, use_bf16_matmul=True):
    """MutualInformationAlignment.forward.

    x, y: (B, D).  w1, w2: (D, D) stored as (in, out) so the kernel computes
    v @ W + b (== PyTorch v @ weight.T + bias).  b1, b2: (1, D) or (D,).
    With use_bf16_matmul=True only the two MXU dots run in bf16 (f32 accum);
    all MI / log math stays f32 (small, documented deviation from f32 ref).
    """
    b, d = x.shape
    xy = jnp.concatenate([x, y], axis=0).astype(jnp.float32)      # (2B, D)
    b1f = b1.reshape(1, d).astype(jnp.float32)
    b2f = b2.reshape(1, d).astype(jnp.float32)

    if use_bf16_matmul:
        xy_in = xy.astype(jnp.bfloat16)
        w1_in = w1.astype(jnp.bfloat16)
        w2_in = w2.astype(jnp.bfloat16)
    else:
        xy_in = xy
        w1_in = w1.astype(jnp.float32)
        w2_in = w2.astype(jnp.float32)

    tk = _choose_hidden_tile(d)
    rt = _choose_row_tile(d)
    nk = d // tk

    kernel = functools.partial(mi_alignment_kernel, batch=b, row_tile=rt)

    # TODO(synk): on v7x, split the hidden-dim (k) tiles across the two
    # TensorCores (core_map + CMEM partial combine); single-TC here.
    grid_spec = pltpu.PrefetchScalarGridSpec(
        num_scalar_prefetch=0,
        grid=(nk,),
        in_specs=[
            pl.BlockSpec((2 * b, d), lambda k: (0, 0)),           # [x; y], resident
            pl.BlockSpec((d, tk), lambda k: (0, k)),              # w1 column tile
            pl.BlockSpec((1, tk), lambda k: (0, k)),              # b1 tile
            pl.BlockSpec((tk, d), lambda k: (k, 0)),              # w2 row tile
            pl.BlockSpec((1, d), lambda k: (0, 0)),               # b2, resident
        ],
        out_specs=pl.BlockSpec((1, 1), lambda k: (0, 0)),
        scratch_shapes=[pltpu.VMEM((2 * b, d), jnp.float32)],     # fc accumulator
    )

    mi = pl.pallas_call(
        kernel,
        out_shape=jax.ShapeDtypeStruct((1, 1), jnp.float32),
        grid_spec=grid_spec,
        compiler_params=pltpu.CompilerParams(
            dimension_semantics=("arbitrary",),                   # k is a reduction axis
            # D=1024, tk=256, bf16 weights: ~2 MiB double-buffered weight
            # tiles + 64 KiB accumulator + ~1 MiB log slab; 32 MiB leaves
            # ample headroom and fits under v7x's 64 MiB physical VMEM.
            vmem_limit_bytes=32 * 1024 * 1024,
        ),
    )(xy_in, w1_in, b1f, w2_in, b2f)
    return mi[0, 0]


if __name__ == "__main__":
    key = jax.random.PRNGKey(0)
    kx, ky, k1, k2, k3, k4 = jax.random.split(key, 6)
    D, B = FEATURE_DIM, BATCH

    x = jax.random.normal(kx, (B, D), jnp.float32)
    y = jax.random.normal(ky, (B, D), jnp.float32)

    # Deterministic synthetic parameters (PyTorch-Linear-like uniform init),
    # stored as (in, out) so the kernel computes v @ W + b.
    bound = 1.0 / (D ** 0.5)
    w1 = jax.random.uniform(k1, (D, D), jnp.float32, -bound, bound)
    b1 = jax.random.uniform(k2, (1, D), jnp.float32, -bound, bound)
    w2 = jax.random.uniform(k3, (D, D), jnp.float32, -bound, bound)
    b2 = jax.random.uniform(k4, (1, D), jnp.float32, -bound, bound)

    mi = mi_alignment_forward(x, y, w1, b1, w2, b2)
    jax.block_until_ready(mi)
    print("KERNEL_OK")
</pallas_src>

<mosaic_0001>
module attributes {stable_mosaic.version = 11 : i64} {
  func.func @mi_alignment_kernel(%arg0: i32, %arg1: memref<16x128xbf16, #tpu.memory_space<vmem>>, %arg2: memref<128x128xbf16, #tpu.memory_space<vmem>>, %arg3: memref<1x128xf32, #tpu.memory_space<vmem>>, %arg4: memref<128x128xbf16, #tpu.memory_space<vmem>>, %arg5: memref<1x128xf32, #tpu.memory_space<vmem>>, %arg6: memref<1x1xf32, #tpu.memory_space<vmem>>, %arg7: memref<16x128xf32, #tpu.memory_space<vmem>>) attributes {dimension_semantics = [#tpu.dimension_semantics<arbitrary>], iteration_bounds = array<i64: 1>, scalar_prefetch = 0 : i64, scratch_operands = 1 : i64, tpu.core_type = #tpu.core_type<tc>, window_params = [{pipeline_mode = #tpu.pipeline_mode<synchronous>, transform_indices = @transform_0, window_bounds = array<i64: 16, 128>}, {transform_indices = @transform_1, window_bounds = array<i64: 128, 128>}, {transform_indices = @transform_2, window_bounds = array<i64: 1, 128>}, {transform_indices = @transform_3, window_bounds = array<i64: 128, 128>}, {pipeline_mode = #tpu.pipeline_mode<synchronous>, transform_indices = @transform_4, window_bounds = array<i64: 1, 128>}, {pipeline_mode = #tpu.pipeline_mode<synchronous>, transform_indices = @transform_5, window_bounds = array<i64: 1, 1>}]} {
    %c0_i32 = arith.constant 0 : i32
    %0 = arith.cmpi eq, %arg0, %c0_i32 : i32
    %1 = arith.extui %0 : i1 to i32
    %c0_i32_0 = arith.constant 0 : i32
    %2 = arith.cmpi ne, %1, %c0_i32_0 : i32
    scf.if %2 {
      %c0_16 = arith.constant 0 : index
      %c0_17 = arith.constant 0 : index
      %20 = vector.load %arg5[%c0_16, %c0_17] : memref<1x128xf32, #tpu.memory_space<vmem>>, vector<1x128xf32>
      %21 = vector.shape_cast %20 : vector<1x128xf32> to vector<1x128xf32>
      %22 = vector.broadcast %21 : vector<1x128xf32> to vector<16x128xf32>
      %c0_18 = arith.constant 0 : index
      %c0_19 = arith.constant 0 : index
      %23 = vector.load %arg7[%c0_18, %c0_19] : memref<16x128xf32, #tpu.memory_space<vmem>>, vector<16x128xf32>
      tpu.vector_store %arg7[%c0_18, %c0_19], %22 {strides = array<i32>} : memref<16x128xf32, #tpu.memory_space<vmem>>, vector<16x128xf32>,
    } else {
    }
    %c0 = arith.constant 0 : index
    %c0_1 = arith.constant 0 : index
    %3 = vector.load %arg1[%c0, %c0_1] : memref<16x128xbf16, #tpu.memory_space<vmem>>, vector<16x128xbf16>
    %c0_2 = arith.constant 0 : index
    %c0_3 = arith.constant 0 : index
    %4 = vector.load %arg2[%c0_2, %c0_3] : memref<128x128xbf16, #tpu.memory_space<vmem>>, vector<128x128xbf16>
    %cst = arith.constant dense<0.000000e+00> : vector<16x128xf32>
    %5 = tpu.matmul %3, %4, %cst {dimension_numbers = #tpu.dot_dimension_numbers<[1], [0], [0], [1], [0, 0, 1, 1], [], []>} : vector<16x128xbf16>, vector<128x128xbf16>, vector<16x128xf32> -> vector<16x128xf32>
    %c0_4 = arith.constant 0 : index
    %c0_5 = arith.constant 0 : index
    %6 = vector.load %arg3[%c0_4, %c0_5] : memref<1x128xf32, #tpu.memory_space<vmem>>, vector<1x128xf32>
    %7 = vector.broadcast %6 : vector<1x128xf32> to vector<16x128xf32>
    %8 = arith.addf %5, %7 : vector<16x128xf32>
    %cst_6 = arith.constant 0.000000e+00 : f32
    %9 = vector.broadcast %cst_6 : f32 to vector<16x128xf32>
    %10 = arith.maximumf %8, %9 : vector<16x128xf32>
    %11 = arith.truncf %10 : vector<16x128xf32> to vector<16x128xbf16>
    %c0_7 = arith.constant 0 : index
    %c0_8 = arith.constant 0 : index
    %12 = vector.load %arg7[%c0_7, %c0_8] : memref<16x128xf32, #tpu.memory_space<vmem>>, vector<16x128xf32>
    %c0_9 = arith.constant 0 : index
    %c0_10 = arith.constant 0 : index
    %13 = vector.load %arg4[%c0_9, %c0_10] : memref<128x128xbf16, #tpu.memory_space<vmem>>, vector<128x128xbf16>
    %cst_11 = arith.constant dense<0.000000e+00> : vector<16x128xf32>
    %14 = tpu.matmul %11, %13, %cst_11 {dimension_numbers = #tpu.dot_dimension_numbers<[1], [0], [0], [1], [0, 0, 1, 1], [], []>} : vector<16x128xbf16>, vector<128x128xbf16>, vector<16x128xf32> -> vector<16x128xf32>
    %15 = arith.addf %12, %14 : vector<16x128xf32>
    %c0_12 = arith.constant 0 : index
    %c0_13 = arith.constant 0 : index
    %16 = vector.load %arg7[%c0_12, %c0_13] : memref<16x128xf32, #tpu.memory_space<vmem>>, vector<16x128xf32>
    tpu.vector_store %arg7[%c0_12, %c0_13], %15 {strides = array<i32>} : memref<16x128xf32, #tpu.memory_space<vmem>>, vector<16x128xf32>,
    %c0_i32_14 = arith.constant 0 : i32
    %17 = arith.cmpi eq, %arg0, %c0_i32_14 : i32
    %18 = arith.extui %17 : i1 to i32
    %c0_i32_15 = arith.constant 0 : i32
    %19 = arith.cmpi ne, %18, %c0_i32_15 : i32
    scf.if %19 {
      %c0_16 = arith.constant 0 : index
      %c0_17 = arith.constant 0 : index
      %20 = vector.load %arg7[%c0_16, %c0_17] : memref<16x128xf32, #tpu.memory_space<vmem>>, vector<16x128xf32>
      %21 = vector.extract_strided_slice %20 {offsets = [0, 0], sizes = [8, 128], strides = [1, 1]} : vector<16x128xf32> to vector<8x128xf32>
      %22 = vector.extract_strided_slice %20 {offsets = [8, 0], sizes = [8, 128], strides = [1, 1]} : vector<16x128xf32> to vector<8x128xf32>
      %cst_18 = arith.constant dense<0.000000e+00> : vector<8xf32>
      %23 = vector.multi_reduction <add>, %22, %cst_18 [1] : vector<8x128xf32> to vector<8xf32>
      %24 = vector.shape_cast %23 : vector<8xf32> to vector<8x1xf32>
      %25 = vector.broadcast %24 : vector<8x1xf32> to vector<8x128xf32>
      %26 = arith.divf %22, %25 : vector<8x128xf32>
      %cst_19 = arith.constant 9.99999971E-10 : f32
      %27 = vector.broadcast %cst_19 : f32 to vector<8x128xf32>
      %28 = arith.addf %26, %27 : vector<8x128xf32>
      %29 = math.log %28 : vector<8x128xf32>
      %30 = arith.mulf %26, %29 : vector<8x128xf32>
      %cst_20 = arith.constant dense<0.000000e+00> : vector<8xf32>
      %31 = vector.multi_reduction <add>, %30, %cst_20 [1] : vector<8x128xf32> to vector<8xf32>
      %32 = vector.shape_cast %31 : vector<8xf32> to vector<8x1xf32>
      %cst_21 = arith.constant dense<0.000000e+00> : vector<1xf32>
      %33 = vector.multi_reduction <add>, %32, %cst_21 [0] : vector<8x1xf32> to vector<1xf32>
      %34 = vector.shape_cast %33 : vector<1xf32> to vector<1x1xf32>
      %cst_22 = arith.constant 1.280000e+02 : f32
      %35 = vector.broadcast %cst_22 : f32 to vector<1x1xf32>
      %36 = arith.mulf %34, %35 : vector<1x1xf32>
      %cst_23 = arith.constant dense<0.000000e+00> : vector<128xf32>
      %37 = vector.multi_reduction <add>, %22, %cst_23 [0] : vector<8x128xf32> to vector<128xf32>
      %38 = vector.shape_cast %37 : vector<128xf32> to vector<1x128xf32>
      %cst_24 = arith.constant 1.250000e-01 : f32
      %39 = vector.broadcast %cst_24 : f32 to vector<1x128xf32>
      %40 = arith.mulf %38, %39 : vector<1x128xf32>
      %cst_25 = arith.constant 1.000000e+00 : f32
      %41 = vector.broadcast %cst_25 : f32 to vector<8x1xf32>
      %cst_26 = arith.constant dense<0.000000e+00> : vector<128x1xf32>
      %42 = tpu.matmul %21, %41, %cst_26 {dimension_numbers = #tpu.dot_dimension_numbers<[0], [0], [1], [1], [0, 1, 1, 1], [], []>} : vector<8x128xf32>, vector<8x1xf32>, vector<128x1xf32> -> vector<128x1xf32>
      %cst_27 = arith.constant 1.250000e-01 : f32
      %43 = vector.broadcast %cst_27 : f32 to vector<128x1xf32>
      %44 = arith.mulf %42, %43 : vector<128x1xf32>
      %cst_28 = arith.constant dense<0.000000e+00> : vector<128xf32>
      %45 = vector.multi_reduction <add>, %26, %cst_28 [0] : vector<8x128xf32> to vector<128xf32>
      %46 = vector.shape_cast %45 : vector<128xf32> to vector<1x128xf32>
      %cst_29 = arith.constant 0.000000e+00 : f32
      %47 = vector.broadcast %cst_29 : f32 to vector<1x1xf32>
      %48 = vector.broadcast %44 : vector<128x1xf32> to vector<128x128xf32>
      %49 = vector.broadcast %40 : vector<1x128xf32> to vector<128x128xf32>
      %50 = arith.mulf %48, %49 : vector<128x128xf32>
      %cst_30 = arith.constant 9.99999971E-10 : f32
      %51 = vector.broadcast %cst_30 : f32 to vector<128x128xf32>
      %52 = arith.addf %50, %51 : vector<128x128xf32>
      %53 = math.log %52 : vector<128x128xf32>
      %cst_31 = arith.constant dense<0.000000e+00> : vector<128x1xf32>
      %54 = tpu.matmul %53, %46, %cst_31 {dimension_numbers = #tpu.dot_dimension_numbers<[1], [1], [0], [0], [0, 0, 1, 0], [], []>} : vector<128x128xf32>, vector<1x128xf32>, vector<128x1xf32> -> vector<128x1xf32>
      %cst_32 = arith.constant dense<0.000000e+00> : vector<1xf32>
      %55 = vector.multi_reduction <add>, %54, %cst_32 [0] : vector<128x1xf32> to vector<1xf32>
      %56 = vector.shape_cast %55 : vector<1xf32> to vector<1x1xf32>
      %57 = arith.addf %47, %56 : vector<1x1xf32>
      %58 = arith.subf %36, %57 : vector<1x1xf32>
      %c0_33 = arith.constant 0 : index
      %c0_34 = arith.constant 0 : index
      %59 = vector.load %arg6[%c0_33, %c0_34] : memref<1x1xf32, #tpu.memory_space<vmem>>, vector<1x1xf32>
      tpu.vector_store %arg6[%c0_33, %c0_34], %58 {strides = array<i32>} : memref<1x1xf32, #tpu.memory_space<vmem>>, vector<1x1xf32>,
    } else {
    }
    return
  }
  func.func @transform_0(%arg0: i32) -> (i32, i32) {
    %c0_i32 = arith.constant 0 : i32
    %c0_i32_0 = arith.constant 0 : i32
    %c0_i32_1 = arith.constant 0 : i32
    return %c0_i32, %c0_i32_0 : i32, i32
  }
  func.func @transform_1(%arg0: i32) -> (i32, i32) {
    %c0_i32 = arith.constant 0 : i32
    %c0_i32_0 = arith.constant 0 : i32
    return %c0_i32, %arg0 : i32, i32
  }
  func.func @transform_2(%arg0: i32) -> (i32, i32) {
    %c0_i32 = arith.constant 0 : i32
    %c0_i32_0 = arith.constant 0 : i32
    return %c0_i32, %arg0 : i32, i32
  }
  func.func @transform_3(%arg0: i32) -> (i32, i32) {
    %c0_i32 = arith.constant 0 : i32
    %c0_i32_0 = arith.constant 0 : i32
    return %arg0, %c0_i32 : i32, i32
  }
  func.func @transform_4(%arg0: i32) -> (i32, i32) {
    %c0_i32 = arith.constant 0 : i32
    %c0_i32_0 = arith.constant 0 : i32
    %c0_i32_1 = arith.constant 0 : i32
    return %c0_i32, %c0_i32_0 : i32, i32
  }
  func.func @transform_5(%arg0: i32) -> (i32, i32) {
    %c0_i32 = arith.constant 0 : i32
    %c0_i32_0 = arith.constant 0 : i32
    %c0_i32_1 = arith.constant 0 : i32
    return %c0_i32, %c0_i32_0 : i32, i32
  }
}

</mosaic_0001>

<bundles_post_ra>
// kernel: mi_alignment_forward.1
= control target key start
LH: loop header
LB: loop body
LE: loop exit
PB: predicated region body
PF: predicated region fallthrough
CT: control target
= control target key end

     0   :  { %v997_v1 = vmov 0.0   ;;  %vm998_vm0 = vmmov 0   ;;  %s1156_s0 = inlined_call_operand.vmem [shape: bf16[16,128], index: 0, kind: input, shape index: {}]   ;;  %s1157_s1 = inlined_call_operand.vmem [shape: bf16[128,128], index: 1, kind: input, shape index: {}]   ;;  %s1158_s2 = inlined_call_operand.vmem [shape: f32[1,128], index: 2, kind: input, shape index: {}]   ;;  %s1159_s3 = inlined_call_operand.vmem [shape: bf16[128,128], index: 3, kind: input, shape index: {}]   ;;  %s1160_s4 = inlined_call_operand.vmem [shape: f32[1,128], index: 4, kind: input, shape index: {}]   ;;  %s1161_s5 = inlined_call_operand.hbm [shape: f32[1,1], index: 5, kind: output, shape index: {}]  }
   0x1   :  { %v922_v0 = vld [vmem:[%s1157_s1 + $0x38] sm:$0xff]   ;;  %847 = vmatprep.subr.bf16.mxu0 %v997_v1  ;;  %867 = vmatprep.subr.bf16.mxu1 %v997_v1  ;;  %v923_v2 = vld [vmem:[%s1157_s1 + $0x30] sm:$0xff]   ;;  %v924_v3 = vld [vmem:[%s1157_s1 + $0x28] sm:$0xff]  }
   0x2   :  { %848 = vmatpush3.bf16.msra.mxu0 %v922_v0  ;;  %863 = vmatprep.mubr.msk.bf16.mxu0 %vm998_vm0, %v997_v1  ;;  %v931_v4 = vld [vmem:[%s1159_s3 + $0x38] sm:$0xff]   ;;  %v925_v5 = vld [vmem:[%s1157_s1 + $0x20] sm:$0xff]   ;;  %v932_v6 = vld [vmem:[%s1159_s3 + $0x30] sm:$0xff]  }
   0x3   :  { %849 = vmatprep.subr.bf16.mxu0 %v997_v1  ;;  %883 = vmatprep.mubr.msk.bf16.mxu1 %vm998_vm0, %v997_v1  ;;  %v926_v7 = vld [vmem:[%s1157_s1 + $0x18] sm:$0xff]   ;;  %v933_v8 = vld [vmem:[%s1159_s3 + $0x28] sm:$0xff]  }
   0x4   :  { %868 = vmatpush3.bf16.msra.mxu1 %v931_v4 }
   0x5   :  { %869 = vmatprep.subr.bf16.mxu1 %v997_v1 }
   0x6   :  { %850 = vmatpush3.bf16.msra.mxu0 %v923_v2 }
   0x7   :  { %851 = vmatprep.subr.bf16.mxu0 %v997_v1 }
   0x8   :  { %870 = vmatpush3.bf16.msra.mxu1 %v932_v6 }
   0x9   :  { %871 = vmatprep.subr.bf16.mxu1 %v997_v1 }
   0xa   :  { %852 = vmatpush3.bf16.msra.mxu0 %v924_v3 }
   0xb   :  { %853 = vmatprep.subr.bf16.mxu0 %v997_v1 }
   0xe   :  { %854 = vmatpush3.bf16.msra.mxu0 %v925_v5 }
   0xf   :  { %855 = vmatprep.subr.bf16.mxu0 %v997_v1 }
  0x10   :  { %10 = vsyncpa [#allocation4], 0  ;;  %v927_v9 = vld [vmem:[%s1157_s1 + $0x10] sm:$0xff]   ;;  %872 = vmatpush3.bf16.msra.mxu1 %v933_v8  ;;  %v934_v10 = vld [vmem:[%s1159_s3 + $0x20] sm:$0xff]   ;;  %v999_v28 = vmov 1.0   ;;  %vm330_vm1 = vcmask 64512  }
  0x11   :  { %873 = vmatprep.subr.bf16.mxu1 %v997_v1  ;;  %v928_v11 = vld [vmem:[%s1157_s1 + $0x8] sm:$0xff]   ;;  %v935_v12 = vld [vmem:[%s1159_s3 + $0x18] sm:$0xff]   ;;  %v929_v13 = vld [vmem:[%s1157_s1] sm:$0xff]   ;;  %v1000_v52 = vmov 0   ;;  %vm761_vm2 = vcmask 0  }
  0x12   :  { %856 = vmatpush3.bf16.msra.mxu0 %v926_v7  ;;  %v930_v14 = vld [vmem:[%s1156_s0] sm:$0xff]   ;;  %v936_v15 = vld [vmem:[%s1159_s3 + $0x10] sm:$0xff]   ;;  %v937_v16 = vld [vmem:[%s1159_s3 + $0x8] sm:$0xff]   ;;  %920 = vset.pattern.permute.xlu1 %v1000_v52 }
  0x13   :  { %857 = vmatprep.subr.bf16.mxu0 %v997_v1  ;;  %v938_v17 = vld [vmem:[%s1159_s3] sm:$0xff]  }
  0x14   :  { %874 = vmatpush3.bf16.msra.mxu1 %v934_v10  ;;  %v778_v18 = vld [vmem:[%s1158_s2] ss:$0 sm:$0xff]  ;;  %s1001_s2 = smov [#allocation3]  }
  0x15   :  { %875 = vmatprep.subr.bf16.mxu1 %v997_v1  ;;  %v777_v29 = vld [vmem:[%s1160_s4] ss:$0 sm:$0xff]  ;;  %s769_s4 = sshll.u32 %s1001_s2, 4  ;;  %s770_s4 = int_to_ptr.vmem [resolvable:$true] %s769_s4 }
  0x16   :  { %858 = vmatpush3.bf16.msra.mxu0 %v927_v9  ;;  %s975_s28 = scalar_lea.vmem %s770_s4, 16  ;;  %s979_s29 = scalar_lea.vmem %s770_s4, 32 }
  0x17   :  { %859 = vmatprep.subr.bf16.mxu0 %v997_v1  ;;  %p976_p0 = scmp.ne.s32.totalorder %s770_s4, %s975_s28  ;;  %p980_p1 = scmp.lt.s32.totalorder %s770_s4, %s770_s4 }
  0x18   :  { %876 = vmatpush3.bf16.msra.mxu1 %v935_v12  ;;  %p981_p2 = scmp.lt.s32.totalorder %s979_s29, %s975_s28 }
  0x19   :  { %877 = vmatprep.subr.bf16.mxu1 %v997_v1 }
  0x1a   :  { %860 = vmatpush3.bf16.msra.mxu0 %v928_v11  ;;  %p982_p3 = por %p981_p2, %p980_p1 }
  0x1b   :  { %861 = vmatprep.subr.bf16.mxu0 %v997_v1 }
  0x1c   :  { %878 = vmatpush3.bf16.msra.mxu1 %v936_v15  ;;  %p983_p4 = pnand %p982_p3, %p976_p0 }
  0x1d   :  { %879 = vmatprep.subr.bf16.mxu1 %v997_v1 }
  0x1e   :  { %862 = vmatpush3.bf16.msra.mxu0 %v929_v13 }
  0x1f   :  { %887 = vmatprep.subr.mxu0 %v999_v28 }
  0x20   :  { %880 = vmatpush3.bf16.msra.mxu1 %v937_v16 }
  0x21   :  { %864 = vmatmul.mubr.bf16.vlgmr.msra.gmra.mxu0 %v930_v14  ;;  %881 = vmatprep.subr.bf16.mxu1 %v997_v1 }
  0x22   :  { %888 = vmatpush3.msra.mxu0 %v999_v28 }
  0x24   :  { %882 = vmatpush3.bf16.msra.mxu1 %v938_v17 }
  0x25   :  { %913 = vmatprep.subr.mxu1 %v999_v28 }
  0xe1   :  { %v148_v19 = vpop.f32.mrf.mxu0 }
  0xe2   :  { %v149_v21 = vadd.f32 %v778_v18, %v148_v19 }
  0xe3   :  { %v865_v20 = vpop.f32.mrf.mxu0 }
  0xe4   :  { %v155_v25 = vmax.f32 %v149_v21, 0.0 }
  0xe5   :  { %v151_v22 = vpop.f32.mrf.mxu0 }
  0xe6   :  { %v152_v23 = vadd.f32 %v778_v18, %v151_v22 }
  0xe7   :  { %v866_v24 = vpop.f32.mrf.mxu0 }
  0xe8   :  { %v156_v26 = vmax.f32 %v152_v23, 0.0 }
  0xea   :  { %v157_v27 = vpack.c.bf16 %v156_v26, %v155_v25 }
  0xec   :  { %884 = vmatmul.mubr.bf16.vlgmr.msra.gmra.mxu1 %v157_v27 }
  0xed   :  { %914 = vmatpush3.msra.mxu1 %v999_v28 }
 0x1ac   :  { %v258_v30 = vpop.f32.mrf.mxu1 }
 0x1ad   :  { %v265_v31 = vadd.f32 %v777_v29, %v258_v30 }
 0x1ae   :  { %v885_v32 = vpop.f32.mrf.mxu1 }
 0x1af   :  { %298 = vxpose.xlu0.b32.start.end [1/1] (short) %v265_v31, 128 }
 0x1b0   :  { %v261_v33 = vpop.f32.mrf.mxu1 }
 0x1b1   :  { %v1089_v34 = vadd.f32 %v777_v29, %v261_v33 }
 0x1b2   :  { %v886_v35 = vpop.f32.mrf.mxu1 }
 0x1b3   :  { %v291_v21 = vrot.slane %v1089_v34, 4 }
 0x1b5   :  { %v292_v23 = vadd.f32 %v291_v21, %v1089_v34 }
 0x1b7   :  { %v293_v24 = vrot.slane %v292_v23, 2 }
 0x1b9   :  { %v294_v25 = vadd.f32 %v293_v24, %v292_v23 }
 0x1bb   :  { %v295_v26 = vrot.slane %v294_v25, 1 }
 0x1bd   :  { %v296_v28 = vadd.f32 %v295_v26, %v294_v25 }
 0x1bf   :  { %v1113_v30 = vmul.f32 0.125, %v296_v28 }
 0x1d8   :  { %921 = vset.pattern.permute.xlu0 %v1000_v52 }
 0x218   :  { %274 = vadd.xlane.f32.xlu0 %v1089_v34 }
 0x22b   :  { %v314_v36 = vpop.trf.xlu0 }
 0x22c   :  { %889 = vmatprep.mubr.msk.f32.mxu0 %vm330_vm1, %v314_v36 }
 0x22f   :  { %v315_v37 = vpop.trf.xlu0 }
 0x230   :  { %890 = vmatmul.mubr.msk.f32.vlgmr.msra.gmra.mxu0 %vm330_vm1, %v315_v37 }
 0x233   :  { %v316_v38 = vpop.trf.xlu0 }
 0x234   :  { %892 = vmatprep.mubr.msk.f32.mxu0 %vm330_vm1, %v316_v38 }
 0x237   :  { %v317_v39 = vpop.trf.xlu0 }
 0x238   :  { %893 = vmatmul.mubr.msk.f32.gmra.mxu0 %vm330_vm1, %v317_v39 }
 0x23b   :  { %v318_v40 = vpop.trf.xlu0 }
 0x23c   :  { %895 = vmatprep.mubr.msk.f32.mxu0 %vm330_vm1, %v318_v40 }
 0x23f   :  { %v319_v41 = vpop.trf.xlu0 }
 0x240   :  { %896 = vmatmul.mubr.msk.f32.gmra.mxu0 %vm330_vm1, %v319_v41 }
 0x243   :  { %v320_v42 = vpop.trf.xlu0 }
 0x244   :  { %898 = vmatprep.mubr.msk.f32.mxu0 %vm330_vm1, %v320_v42 }
 0x247   :  { %v321_v43 = vpop.trf.xlu0 }
 0x248   :  { %899 = vmatmul.mubr.msk.f32.gmra.mxu0 %vm330_vm1, %v321_v43 }
 0x24b   :  { %v322_v44 = vpop.trf.xlu0 }
 0x24c   :  { %901 = vmatprep.mubr.msk.f32.mxu1 %vm330_vm1, %v322_v44 }
 0x24f   :  { %v323_v45 = vpop.trf.xlu0 }
 0x250   :  { %902 = vmatmul.mubr.msk.f32.vlgmr.msra.gmra.mxu1 %vm330_vm1, %v323_v45 }
 0x253   :  { %v324_v46 = vpop.trf.xlu0 }
 0x254   :  { %904 = vmatprep.mubr.msk.f32.mxu1 %vm330_vm1, %v324_v46 }
 0x257   :  { %v325_v47 = vpop.trf.xlu0 }
 0x258   :  { %905 = vmatmul.mubr.msk.f32.gmra.mxu1 %vm330_vm1, %v325_v47 }
 0x25b   :  { %v326_v48 = vpop.trf.xlu0 }
 0x25c   :  { %907 = vmatprep.mubr.msk.f32.mxu1 %vm330_vm1, %v326_v48 }
 0x25f   :  { %v327_v49 = vpop.trf.xlu0 }
 0x260   :  { %908 = vmatmul.mubr.msk.f32.gmra.mxu1 %vm330_vm1, %v327_v49 }
 0x263   :  { %v328_v50 = vpop.trf.xlu0 }
 0x264   :  { %910 = vmatprep.mubr.msk.f32.mxu1 %vm330_vm1, %v328_v50 }
 0x267   :  { %v329_v51 = vpop.trf.xlu0 }
 0x268   :  { %911 = vmatmul.mubr.msk.f32.gmra.mxu1 %vm330_vm1, %v329_v51 }
 0x2a1   :  { %v275_v22 = vpop.xlane.xlu0 %274 }
 0x2a2   :  { %939 = vrcp.f32 %v275_v22 }
 0x2af   :  { %v940_v27 = vpop.eup %939 }
 0x2b0   :  { %v1111_v29 = vmul.f32 %v940_v27, %v1089_v34 }
 0x2b2   :  { %v540_v31 = vrot.slane %v1111_v29, 4 }
 0x2b4   :  { %v541_v35 = vadd.f32 %v540_v31, %v1111_v29 }
 0x2b6   :  { %v542_v39 = vrot.slane %v541_v35, 2 }
 0x2b8   :  { %v543_v42 = vadd.f32 %v542_v39, %v541_v35 }
 0x2ba   :  { %v544_v46 = vrot.slane %v543_v42, 1 }
 0x2bc   :  { %v1122_v51 = vadd.f32 %v544_v46, %v543_v42 }
 0x2f0   :  { %v891_v53 = vpop.f32.mrf.mxu0 }
 0x2f1   :  { %v525_v54 = vmul.f32 0.125, %v891_v53 }
 0x2f2   :  { %v445_v55 = vpop.f32.mrf.mxu0 }
 0x2f3   :  { %553 = vperm.xlu1 %920, %v525_v54   ;;  %v524_v56 = vmul.f32 0.125, %v445_v55 }
 0x2f7   :  { %548 = vperm.xlu1 %920, %v524_v56  }
 0x2f8   :  { %v894_v57 = vpop.f32.mrf.mxu0 }
 0x2f9   :  { %v527_v58 = vmul.f32 0.125, %v894_v57 }
 0x2fa   :  { %v455_v59 = vpop.f32.mrf.mxu0 }
 0x2fb   :  { %563 = vperm.xlu1 %920, %v527_v58   ;;  %v526_v60 = vmul.f32 0.125, %v455_v59 }
 0x2ff   :  { %558 = vperm.xlu1 %920, %v526_v60  }
 0x300   :  { %v897_v61 = vpop.f32.mrf.mxu0 }
 0x301   :  { %v529_v62 = vmul.f32 0.125, %v897_v61 }
 0x302   :  { %v465_v63 = vpop.f32.mrf.mxu0 }
 0x303   :  { %573 = vperm.xlu1 %920, %v529_v62   ;;  %v528_v0 = vmul.f32 0.125, %v465_v63 }
 0x307   :  { %568 = vperm.xlu1 %920, %v528_v0  }
 0x308   :  { %v900_v1 = vpop.f32.mrf.mxu0 }
 0x309   :  { %v531_v2 = vmul.f32 0.125, %v900_v1 }
 0x30a   :  { %v475_v3 = vpop.f32.mrf.mxu0 }
 0x30b   :  { %583 = vperm.xlu1 %920, %v531_v2   ;;  %v530_v4 = vmul.f32 0.125, %v475_v3 }
 0x30f   :  { %578 = vperm.xlu1 %920, %v530_v4  }
 0x310   :  { %v903_v5 = vpop.f32.mrf.mxu1 }
 0x311   :  { %v533_v6 = vmul.f32 0.125, %v903_v5 }
 0x312   :  { %v485_v7 = vpop.f32.mrf.mxu1 }
 0x313   :  { %593 = vperm.xlu1 %920, %v533_v6   ;;  %v532_v8 = vmul.f32 0.125, %v485_v7 }
 0x317   :  { %588 = vperm.xlu1 %920, %v532_v8  }
 0x318   :  { %v906_v9 = vpop.f32.mrf.mxu1 }
 0x319   :  { %v535_v10 = vmul.f32 0.125, %v906_v9 }
 0x31a   :  { %v495_v11 = vpop.f32.mrf.mxu1 }
 0x31b   :  { %603 = vperm.xlu1 %920, %v535_v10   ;;  %v534_v12 = vmul.f32 0.125, %v495_v11 }
 0x31f   :  { %598 = vperm.xlu1 %920, %v534_v12  }
 0x320   :  { %v909_v13 = vpop.f32.mrf.mxu1 }
 0x321   :  { %v537_v14 = vmul.f32 0.125, %v909_v13 }
 0x322   :  { %v505_v15 = vpop.f32.mrf.mxu1 }
 0x323   :  { %613 = vperm.xlu1 %920, %v537_v14   ;;  %v536_v16 = vmul.f32 0.125, %v505_v15 }
 0x327   :  { %608 = vperm.xlu1 %920, %v536_v16  }
 0x328   :  { %v912_v17 = vpop.f32.mrf.mxu1 }
 0x329   :  { %v539_v20 = vmul.f32 0.125, %v912_v17 }
 0x32a   :  { %v515_v18 = vpop.f32.mrf.mxu1 }
 0x32b   :  { %v538_v19 = vmul.f32 0.125, %v515_v18 }
 0x32d   :  { %618 = vperm.xlu1 %920, %v538_v19  }
 0x331   :  { %623 = vperm.xlu1 %920, %v539_v20  }
 0x36e   :  { %v554_v32 = vpop.permute.xlu1 %553 }
 0x36f   :  { %v627_v33 = vmul.f32 %v554_v32, %v1113_v30 }
 0x371   :  { %v643_v36 = vadd.f32 1e-09, %v627_v33 }
 0x372   :  { %v549_v37 = vpop.permute.xlu1 %548 }
 0x373   :  { %941 = vlog2.f32 %v643_v36  ;;  %v626_v38 = vmul.f32 %v549_v37, %v1113_v30  ;;  %v278_v36 = vadd.f32 1e-09, %v1111_v29 }
 0x375   :  { %v642_v40 = vadd.f32 1e-09, %v626_v38 }
 0x376   :  { %v564_v41 = vpop.permute.xlu1 %563 }
 0x377   :  { %943 = vlog2.f32 %v642_v40  ;;  %v629_v34 = vmul.f32 %v564_v41, %v1113_v30 }
 0x379   :  { %v645_v43 = vadd.f32 1e-09, %v629_v34 }
 0x37a   :  { %v559_v44 = vpop.permute.xlu1 %558 }
 0x37b   :  { %v628_v45 = vmul.f32 %v559_v44, %v1113_v30  ;;  %945 = vlog2.f32 %v645_v43 }
 0x37d   :  { %v644_v47 = vadd.f32 1e-09, %v628_v45 }
 0x37e   :  { %v574_v48 = vpop.permute.xlu1 %573 }
 0x37f   :  { %947 = vlog2.f32 %v644_v47  ;;  %v631_v49 = vmul.f32 %v574_v48, %v1113_v30 }
 0x380   :  { %v942_v50 = vpop.eup %941 }
 0x381   :  { %v647_v52 = vadd.f32 1e-09, %v631_v49  ;;  %v661_v53 = vmul.f32 0.6931472, %v942_v50 }
 0x382   :  { %v569_v54 = vpop.permute.xlu1 %568 }
 0x383   :  { %949 = vlog2.f32 %v647_v52  ;;  %v630_v55 = vmul.f32 %v569_v54, %v1113_v30  ;;  %v691_v56 = vmul.f32 %v661_v53, %v1122_v51 }
 0x384   :  { %v944_v57 = vpop.eup %943 }
 0x385   :  { %v646_v58 = vadd.f32 1e-09, %v630_v55  ;;  %708 = vadd.xlane.f32.xlu1 %v691_v56  ;;  %v659_v59 = vmul.f32 0.6931472, %v944_v57 }
 0x386   :  { %v584_v60 = vpop.permute.xlu1 %583 }
 0x387   :  { %951 = vlog2.f32 %v646_v58  ;;  %v633_v61 = vmul.f32 %v584_v60, %v1113_v30  ;;  %v690_v62 = vmul.f32 %v659_v59, %v1122_v51 }
 0x388   :  { %v946_v1 = vpop.eup %945 }
 0x389   :  { %v649_v63 = vadd.f32 1e-09, %v633_v61  ;;  %706 = vadd.xlane.f32.xlu1 %v690_v62  ;;  %v665_v9 = vmul.f32 0.6931472, %v946_v1 }
 0x38a   :  { %v579_v0 = vpop.permute.xlu1 %578 }
 0x38b   :  { %953 = vlog2.f32 %v649_v63  ;;  %v632_v2 = vmul.f32 %v579_v0, %v1113_v30  ;;  %v693_v14 = vmul.f32 %v665_v9, %v1122_v51 }
 0x38c   :  { %v948_v3 = vpop.eup %947 }
 0x38d   :  { %v648_v4 = vadd.f32 1e-09, %v632_v2  ;;  %v663_v5 = vmul.f32 0.6931472, %v948_v3 }
 0x38e   :  { %v594_v6 = vpop.permute.xlu1 %593 }
 0x38f   :  { %955 = vlog2.f32 %v648_v4  ;;  %v635_v7 = vmul.f32 %v594_v6, %v1113_v30  ;;  %v692_v8 = vmul.f32 %v663_v5, %v1122_v51 }
 0x390   :  { %v950_v10 = vpop.eup %949 }
 0x391   :  { %v651_v11 = vadd.f32 1e-09, %v635_v7  ;;  %710 = vadd.xlane.f32.xlu1 %v692_v8  ;;  %v669_v15 = vmul.f32 0.6931472, %v950_v10 }
 0x392   :  { %v589_v12 = vpop.permute.xlu1 %588 }
 0x393   :  { %957 = vlog2.f32 %v651_v11  ;;  %v634_v13 = vmul.f32 %v589_v12, %v1113_v30  ;;  %v695_v22 = vmul.f32 %v669_v15, %v1122_v51 }
 0x394   :  { %v952_v16 = vpop.eup %951 }
 0x395   :  { %v650_v17 = vadd.f32 1e-09, %v634_v13  ;;  %712 = vadd.xlane.f32.xlu1 %v693_v14  ;;  %v667_v18 = vmul.f32 0.6931472, %v952_v16 }
 0x396   :  { %v604_v19 = vpop.permute.xlu1 %603 }
 0x397   :  { %959 = vlog2.f32 %v650_v17  ;;  %v637_v20 = vmul.f32 %v604_v19, %v1113_v30  ;;  %v694_v21 = vmul.f32 %v667_v18, %v1122_v51 }
 0x398   :  { %v954_v23 = vpop.eup %953 }
 0x399   :  { %v653_v24 = vadd.f32 1e-09, %v637_v20  ;;  %714 = vadd.xlane.f32.xlu0 %v694_v21  ;;  %716 = vadd.xlane.f32.xlu1 %v695_v22  ;;  %v673_v25 = vmul.f32 0.6931472, %v954_v23 }
 0x39a   :  { %v599_v26 = vpop.permute.xlu1 %598 }
 0x39b   :  { %961 = vlog2.f32 %v653_v24  ;;  %v636_v27 = vmul.f32 %v599_v26, %v1113_v30  ;;  %v697_v28 = vmul.f32 %v673_v25, %v1122_v51 }
 0x39c   :  { %v956_v31 = vpop.eup %955 }
 0x39d   :  { %v652_v32 = vadd.f32 1e-09, %v636_v27  ;;  %720 = vadd.xlane.f32.xlu1 %v697_v28  ;;  %v671_v33 = vmul.f32 0.6931472, %v956_v31 }
 0x39e   :  { %v614_v35 = vpop.permute.xlu1 %613 }
 0x39f   :  { %963 = vlog2.f32 %v652_v32  ;;  %v639_v37 = vmul.f32 %v614_v35, %v1113_v30  ;;  %v696_v38 = vmul.f32 %v671_v33, %v1122_v51 }
 0x3a0   :  { %v958_v39 = vpop.eup %957  ;;  %965 = vlog2.f32 %v278_v36 }
 0x3a1   :  { %v655_v40 = vadd.f32 1e-09, %v639_v37  ;;  %718 = vadd.xlane.f32.xlu0 %v696_v38  ;;  %v677_v41 = vmul.f32 0.6931472, %v958_v39 }
 0x3a2   :  { %v609_v34 = vpop.permute.xlu1 %608 }
 0x3a3   :  { %967 = vlog2.f32 %v655_v40  ;;  %v638_v42 = vmul.f32 %v609_v34, %v1113_v30  ;;  %v699_v43 = vmul.f32 %v677_v41, %v1122_v51 }
 0x3a4   :  { %v960_v44 = vpop.eup %959 }
 0x3a5   :  { %v654_v45 = vadd.f32 1e-09, %v638_v42  ;;  %724 = vadd.xlane.f32.xlu1 %v699_v43  ;;  %v675_v46 = vmul.f32 0.6931472, %v960_v44 }
 0x3a7   :  { %969 = vlog2.f32 %v654_v45  ;;  %v698_v47 = vmul.f32 %v675_v46, %v1122_v51 }
 0x3a8   :  { %v962_v48 = vpop.eup %961  ;;  %v619_v49 = vpop.permute.xlu1 %618 }
 0x3a9   :  { %v640_v50 = vmul.f32 %v619_v49, %v1113_v30  ;;  %722 = vadd.xlane.f32.xlu0 %v698_v47  ;;  %v681_v52 = vmul.f32 0.6931472, %v962_v48 }
 0x3ab   :  { %v656_v53 = vadd.f32 1e-09, %v640_v50  ;;  %v701_v54 = vmul.f32 %v681_v52, %v1122_v51 }
 0x3ac   :  { %v964_v55 = vpop.eup %963  ;;  %v624_v56 = vpop.permute.xlu1 %623 }
 0x3ad   :  { %971 = vlog2.f32 %v656_v53  ;;  %v641_v57 = vmul.f32 %v624_v56, %v1113_v30  ;;  %728 = vadd.xlane.f32.xlu1 %v701_v54  ;;  %v679_v58 = vmul.f32 0.6931472, %v964_v55  ;;  %v966_v59 = vpop.eup %965 }
 0x3ae   :  { %v280_v1 = vmul.f32 0.6931472, %v966_v59 }
 0x3af   :  { %v657_v60 = vadd.f32 1e-09, %v641_v57  ;;  %v700_v61 = vmul.f32 %v679_v58, %v1122_v51 }
 0x3b0   :  { %v968_v62 = vpop.eup %967  ;;  %v281_v30 = vmul.f32 %v280_v1, %v1111_v29 }
 0x3b1   :  { %973 = vlog2.f32 %v657_v60  ;;  %726 = vadd.xlane.f32.xlu0 %v700_v61  ;;  %v685_v63 = vmul.f32 0.6931472, %v968_v62 }
 0x3b3   :  { %v703_v0 = vmul.f32 %v685_v63, %v1122_v51 }
 0x3b4   :  { %v970_v2 = vpop.eup %969 }
 0x3b5   :  { %732 = vadd.xlane.f32.xlu1 %v703_v0  ;;  %v683_v3 = vmul.f32 0.6931472, %v970_v2 }
 0x3b7   :  { %v702_v4 = vmul.f32 %v683_v3, %v1122_v51 }
 0x3b9   :  { %730 = vadd.xlane.f32.xlu0 %v702_v4  ;;  %282 = vadd.xlane.f32.xlu1 %v281_v30 }
 0x3ba   :  { %v972_v5 = vpop.eup %971 }
 0x3bb   :  { %v687_v6 = vmul.f32 0.6931472, %v972_v5 }
 0x3bd   :  { %v704_v7 = vmul.f32 %v687_v6, %v1122_v51 }
 0x3be   :  { %v974_v8 = vpop.eup %973 }
 0x3bf   :  { %734 = vadd.xlane.f32.xlu0 %v704_v7  ;;  %v689_v9 = vmul.f32 0.6931472, %v974_v8 }
 0x3c1   :  { %v705_v10 = vmul.f32 %v689_v9, %v1122_v51 }
 0x3c3   :  { %736 = vadd.xlane.f32.xlu0 %v705_v10 }
 0x40e   :  { %v709_v11 = vpop.xlane.xlu1 %708 }
 0x412   :  { %v707_v12 = vpop.xlane.xlu1 %706 }
 0x413   :  { %v738_v15 = vadd.f32 %v709_v11, %v707_v12 }
 0x41a   :  { %v711_v13 = vpop.xlane.xlu1 %710 }
 0x41b   :  { %v739_v16 = vadd.f32 %v738_v15, %v711_v13 }
 0x41e   :  { %v713_v14 = vpop.xlane.xlu1 %712 }
 0x41f   :  { %v740_v29 = vadd.f32 %v739_v16, %v713_v14 }
 0x422   :  { %v715_v17 = vpop.xlane.xlu0 %714  ;;  %v717_v18 = vpop.xlane.xlu1 %716 }
 0x423   :  { %v741_v19 = vadd.f32 %v740_v29, %v715_v17 }
 0x425   :  { %v742_v21 = vadd.f32 %v741_v19, %v717_v18 }
 0x426   :  { %v721_v22 = vpop.xlane.xlu1 %720 }
 0x42a   :  { %v719_v20 = vpop.xlane.xlu0 %718 }
 0x42b   :  { %v743_v23 = vadd.f32 %v742_v21, %v719_v20 }
 0x42d   :  { %v744_v26 = vadd.f32 %v743_v23, %v721_v22 }
 0x42e   :  { %v725_v24 = vpop.xlane.xlu1 %724 }
 0x432   :  { %v723_v25 = vpop.xlane.xlu0 %722 }
 0x433   :  { %v745_v27 = vadd.f32 %v744_v26, %v723_v25 }
 0x435   :  { %v746_v31 = vadd.f32 %v745_v27, %v725_v24 }
 0x436   :  { %v729_v51 = vpop.xlane.xlu1 %728 }
 0x43a   :  { %v727_v28 = vpop.xlane.xlu0 %726 }
 0x43b   :  { %v747_v33 = vadd.f32 %v746_v31, %v727_v28 }
 0x43d   :  { %v748_v37 = vadd.f32 %v747_v33, %v729_v51 }
 0x43e   :  { %v733_v32 = vpop.xlane.xlu1 %732 }
 0x442   :  { %v731_v35 = vpop.xlane.xlu0 %730  ;;  %v283_v36 = vpop.xlane.xlu1 %282 }
 0x443   :  { %v284_v38 = vrot.slane %v283_v36, 4  ;;  %v749_v39 = vadd.f32 %v748_v37, %v731_v35 }
 0x445   :  { %v285_v40 = vadd.f32 %v284_v38, %v283_v36  ;;  %v750_v42 = vadd.f32 %v749_v39, %v733_v32 }
 0x447   :  { %v286_v34 = vrot.slane %v285_v40, 2 }
 0x448   :  { %v735_v41 = vpop.xlane.xlu0 %734 }
 0x449   :  { %v751_v43 = vadd.f32 %v750_v42, %v735_v41  ;;  %v287_v45 = vadd.f32 %v286_v34, %v285_v40 }
 0x44b   :  { %v288_v48 = vrot.slane %v287_v45, 1 }
 0x44c   :  { %v737_v44 = vpop.xlane.xlu0 %736 }
 0x44d   :  { %v752_v46 = vadd.f32 %v751_v43, %v737_v44  ;;  %v289_v52 = vadd.f32 %v288_v48, %v287_v45 }
 0x44f   :  { %v753_v47 = vrot.slane %v752_v46, 4  ;;  %v290_v55 = vmul.f32 128.0, %v289_v52 }
 0x451   :  { %v754_v49 = vadd.f32 %v753_v47, %v752_v46 }
 0x453   :  { %v755_v50 = vrot.slane %v754_v49, 2 }
 0x455   :  { %v756_v53 = vadd.f32 %v755_v50, %v754_v49 }
 0x457   :  { %v757_v54 = vrot.slane %v756_v53, 1 }
 0x459   :  { %v758_v56 = vadd.f32 %v757_v54, %v756_v53 }
 0x45b   :  { %v760_v57 = vsub.f32 %v290_v55, %v758_v56 }
 0x45d   :  { %762 = vst.msk [vmem:[#allocation3] sm:$0x1] %vm761_vm2, %v760_v57 }
 0x45e   :  { %986 = shalt.err (!%p983_p4)
}
 0x45f   :  { %772 = dma.vmem_to_hbm [thread:$0]  %s770_s4, 16, %s1161_s5, [#allocation4]  }
 0x460   :  { %995 = dma.done.wait [#allocation4], 16  }
 0x461   :  { %996 = vsyncadd [#allocation4], 4294967280 }
 0x462   :  { %776 = vsyncpa [#allocation4], 1 }

</bundles_post_ra>
